<compile_context>
chip_gen: v5e
topology: v5e:2x2
jax: 0.10.0
libtpu: 0.0.40
codegen_flags: <defaults>
</compile_context>

<pallas_src>
import functools

import jax
import jax.numpy as jnp
from jax import lax
from jax.experimental import pallas as pl
from jax.experimental.pallas import tpu as pltpu

TEMPERATURE = 0.5
TILE = 128  # query/key tile (rows along sublanes, keys along lanes)


# --------------------------------------------------------------------------
# Kernel 1: linear sentence embedder + L2 normalization (row tiled)
# --------------------------------------------------------------------------
def embed_kernel(x_ref, w_ref, b_ref, emb_ref):
    x = x_ref[...]                                           # [TQ, F] f32
    w = w_ref[...]                                           # [F,  D] f32
    e = jnp.dot(x, w, preferred_element_type=jnp.float32) + b_ref[...]
    # torch F.normalize(p=2, dim=1, eps=1e-12):  e / max(||e||, 1e-12)
    ssq = jnp.sum(e * e, axis=1, keepdims=True)              # [TQ, 1]
    inv_norm = lax.rsqrt(jnp.maximum(ssq, 1e-24))            # EUP rsqrt + mul
    emb_ref[...] = e * inv_norm


# --------------------------------------------------------------------------
# Kernel 2: tiled NxN similarity -> per-row log_prob (online reductions)
# --------------------------------------------------------------------------
def loss_rows_kernel(q_ref, k_ref, lq_ref, lk_ref, out_ref,
                     acc_exp, acc_pos, *, inv_temperature, n_valid,
                     tile_q, tile_k):
    qi = pl.program_id(0)
    ki = pl.program_id(1)

    @pl.when(ki == 0)
    def _init():
        acc_exp[...] = jnp.zeros_like(acc_exp)
        acc_pos[...] = jnp.zeros_like(acc_pos)

    # Fold 1/T into the query operand (N*D multiplies instead of N*N divides).
    q = q_ref[...] * inv_temperature                         # [TQ, D]
    s = lax.dot_general(q, k_ref[...], (((1,), (1,)), ((), ())),
                        preferred_element_type=jnp.float32)  # [TQ, TK]
    e = jnp.exp(s)

    # Fused boolean masks: drop self-similarity and padded key columns; the
    # positive mask additionally requires matching labels.
    row_g = qi * tile_q + lax.broadcasted_iota(jnp.int32, (tile_q, tile_k), 0)
    col_g = ki * tile_k + lax.broadcasted_iota(jnp.int32, (tile_q, tile_k), 1)
    keep = (row_g != col_g) & (col_g < n_valid)
    pos = keep & (lq_ref[...] == lk_ref[...])                # [TQ,1]==[1,TK]

    acc_exp[...] += jnp.sum(jnp.where(keep, e, 0.0), axis=1, keepdims=True)
    acc_pos[...] += jnp.sum(jnp.where(pos, e, 0.0), axis=1, keepdims=True)

    @pl.when(ki == pl.num_programs(1) - 1)
    def _finalize():
        out_ref[...] = jnp.log(acc_pos[...] / acc_exp[...])  # [TQ, 1]


# --------------------------------------------------------------------------
# Wrapper
# --------------------------------------------------------------------------
def simclr_loss(features, weight, bias, labels, *, temperature=TEMPERATURE,
                tile=TILE):
    """features: [N, F] f32, weight: [F, D] f32, bias: [1, D] f32,
    labels: [N] int  ->  scalar loss (f32)."""
    n, f = features.shape
    _, d = weight.shape

    n_pad = ((n + tile - 1) // tile) * tile
    pad = n_pad - n
    x = jnp.pad(features.astype(jnp.float32), ((0, pad), (0, 0)))
    lab = jnp.pad(labels.reshape(-1).astype(jnp.int32), (0, pad),
                  constant_values=-1)
    labels_row = lab.reshape(n_pad, 1)   # layout done outside the kernel
    labels_col = lab.reshape(1, n_pad)

    nq = n_pad // tile
    nk = n_pad // tile

    # --- kernel 1: embeddings -------------------------------------------
    emb = pl.pallas_call(
        embed_kernel,
        out_shape=jax.ShapeDtypeStruct((n_pad, d), jnp.float32),
        grid_spec=pltpu.PrefetchScalarGridSpec(
            num_scalar_prefetch=0,
            grid=(nq,),
            in_specs=[
                pl.BlockSpec((tile, f), lambda i: (i, 0)),
                pl.BlockSpec((f, d), lambda i: (0, 0)),
                pl.BlockSpec((1, d), lambda i: (0, 0)),
            ],
            out_specs=pl.BlockSpec((tile, d), lambda i: (i, 0)),
        ),
        compiler_params=pltpu.CompilerParams(
            dimension_semantics=("parallel",)),
    )(x, weight.astype(jnp.float32), bias.astype(jnp.float32))

    # --- kernel 2: tiled contrastive loss rows ---------------------------
    kernel2 = functools.partial(
        loss_rows_kernel,
        inv_temperature=1.0 / temperature,
        n_valid=n, tile_q=tile, tile_k=tile)

    log_prob = pl.pallas_call(
        kernel2,
        out_shape=jax.ShapeDtypeStruct((n_pad, 1), jnp.float32),
        grid_spec=pltpu.PrefetchScalarGridSpec(
            num_scalar_prefetch=0,
            grid=(nq, nk),
            in_specs=[
                pl.BlockSpec((tile, d), lambda qi, ki: (qi, 0)),  # queries
                pl.BlockSpec((tile, d), lambda qi, ki: (ki, 0)),  # keys
                pl.BlockSpec((tile, 1), lambda qi, ki: (qi, 0)),  # labels rows
                pl.BlockSpec((1, tile), lambda qi, ki: (0, ki)),  # labels cols
            ],
            out_specs=pl.BlockSpec((tile, 1), lambda qi, ki: (qi, 0)),
            scratch_shapes=[pltpu.VMEM((tile, 1), jnp.float32),
                            pltpu.VMEM((tile, 1), jnp.float32)],
        ),
        compiler_params=pltpu.CompilerParams(
            dimension_semantics=("parallel", "arbitrary")),
    )(emb, emb, labels_row, labels_col)

    # Padded rows were never part of the batch: slice them off before the mean.
    return -jnp.mean(log_prob[:n, 0])


# --------------------------------------------------------------------------
# Pure-JAX reference (faithful to the PyTorch module)
# --------------------------------------------------------------------------
def simclr_loss_ref(features, weight, bias, labels, temperature=TEMPERATURE):
    emb = jnp.dot(features, weight, precision=lax.Precision.HIGHEST) + bias
    norm = jnp.maximum(jnp.linalg.norm(emb, axis=1, keepdims=True), 1e-12)
    emb = emb / norm
    cos = jnp.dot(emb, emb.T, precision=lax.Precision.HIGHEST)
    n = cos.shape[0]
    lab = labels.reshape(1, -1)
    mask = (lab.T == lab).astype(jnp.float32) * (1.0 - jnp.eye(n))
    exp_sim = jnp.exp(cos / temperature)
    sum_exp = exp_sim.sum(1, keepdims=True) - jnp.diag(exp_sim)[:, None]
    sum_pos = (exp_sim * mask).sum(1, keepdims=True)
    return -jnp.mean(jnp.log(sum_pos / sum_exp))


if __name__ == "__main__":
    N, F, D = 8, 16, 32  # small shapes consistent with the module

    key = jax.random.PRNGKey(0)
    kx, kw, kb = jax.random.split(key, 3)
    features = jax.random.normal(kx, (N, F), dtype=jnp.float32)
    weight = jax.random.normal(kw, (F, D), dtype=jnp.float32) * 0.1
    bias = jax.random.normal(kb, (1, D), dtype=jnp.float32) * 0.01
    # every label appears at least twice so each row has a positive pair
    labels = jnp.array([0, 0, 1, 1, 2, 2, 3, 3], dtype=jnp.int32)

    loss = jax.block_until_ready(simclr_loss(features, weight, bias, labels))
    ref = simclr_loss_ref(features, weight, bias, labels)
    assert jnp.isfinite(loss), f"non-finite loss: {loss}"
    assert jnp.allclose(loss, ref, rtol=1e-5, atol=1e-5), (loss, ref)

    # Larger batch (N=200 -> padded to 256): exercises the (2, 2) grid,
    # online key-tile reductions and padded row/column masking.
    N2 = 200
    feats2 = jax.random.normal(jax.random.PRNGKey(1), (N2, F),
                               dtype=jnp.float32)
    labels2 = jnp.repeat(jnp.arange(N2 // 2, dtype=jnp.int32), 2)
    loss2 = jax.block_until_ready(simclr_loss(feats2, weight, bias, labels2))
    ref2 = simclr_loss_ref(feats2, weight, bias, labels2)
    assert jnp.isfinite(loss2), f"non-finite loss: {loss2}"
    assert jnp.allclose(loss2, ref2, rtol=1e-5, atol=1e-5), (loss2, ref2)

    print("KERNEL_OK")
</pallas_src>

<mosaic_0001>
module attributes {stable_mosaic.version = 11 : i64} {
  func.func @embed_kernel(%arg0: i32, %arg1: memref<128x16xf32, #tpu.memory_space<vmem>>, %arg2: memref<16x32xf32, #tpu.memory_space<vmem>>, %arg3: memref<1x32xf32, #tpu.memory_space<vmem>>, %arg4: memref<128x32xf32, #tpu.memory_space<vmem>>) attributes {dimension_semantics = [#tpu.dimension_semantics<parallel>], iteration_bounds = array<i64: 1>, scalar_prefetch = 0 : i64, scratch_operands = 0 : i64, tpu.core_type = #tpu.core_type<tc>, window_params = [{transform_indices = @transform_0, window_bounds = array<i64: 128, 16>}, {pipeline_mode = #tpu.pipeline_mode<synchronous>, transform_indices = @transform_1, window_bounds = array<i64: 16, 32>}, {pipeline_mode = #tpu.pipeline_mode<synchronous>, transform_indices = @transform_2, window_bounds = array<i64: 1, 32>}, {transform_indices = @transform_3, window_bounds = array<i64: 128, 32>}]} {
    %c0 = arith.constant 0 : index
    %c0_0 = arith.constant 0 : index
    %0 = vector.load %arg1[%c0, %c0_0] : memref<128x16xf32, #tpu.memory_space<vmem>>, vector<128x16xf32>
    %c0_1 = arith.constant 0 : index
    %c0_2 = arith.constant 0 : index
    %1 = vector.load %arg2[%c0_1, %c0_2] : memref<16x32xf32, #tpu.memory_space<vmem>>, vector<16x32xf32>
    %cst = arith.constant dense<0.000000e+00> : vector<128x32xf32>
    %2 = tpu.matmul %0, %1, %cst {dimension_numbers = #tpu.dot_dimension_numbers<[1], [0], [0], [1], [0, 0, 1, 1], [], []>} : vector<128x16xf32>, vector<16x32xf32>, vector<128x32xf32> -> vector<128x32xf32>
    %c0_3 = arith.constant 0 : index
    %c0_4 = arith.constant 0 : index
    %3 = vector.load %arg3[%c0_3, %c0_4] : memref<1x32xf32, #tpu.memory_space<vmem>>, vector<1x32xf32>
    %4 = vector.broadcast %3 : vector<1x32xf32> to vector<128x32xf32>
    %5 = arith.addf %2, %4 : vector<128x32xf32>
    %6 = arith.mulf %5, %5 : vector<128x32xf32>
    %cst_5 = arith.constant dense<0.000000e+00> : vector<128xf32>
    %7 = vector.multi_reduction <add>, %6, %cst_5 [1] : vector<128x32xf32> to vector<128xf32>
    %8 = vector.shape_cast %7 : vector<128xf32> to vector<128x1xf32>
    %cst_6 = arith.constant 1.000000e-24 : f32
    %9 = vector.broadcast %cst_6 : f32 to vector<128x1xf32>
    %10 = arith.maximumf %8, %9 : vector<128x1xf32>
    %11 = math.rsqrt %10 : vector<128x1xf32>
    %12 = vector.broadcast %11 : vector<128x1xf32> to vector<128x32xf32>
    %13 = arith.mulf %5, %12 : vector<128x32xf32>
    %c0_7 = arith.constant 0 : index
    %c0_8 = arith.constant 0 : index
    %14 = vector.load %arg4[%c0_7, %c0_8] : memref<128x32xf32, #tpu.memory_space<vmem>>, vector<128x32xf32>
    tpu.vector_store %arg4[%c0_7, %c0_8], %13 {strides = array<i32>} : memref<128x32xf32, #tpu.memory_space<vmem>>, vector<128x32xf32>,
    return
  }
  func.func @transform_0(%arg0: i32) -> (i32, i32) {
    %c0_i32 = arith.constant 0 : i32
    %c0_i32_0 = arith.constant 0 : i32
    return %arg0, %c0_i32 : i32, i32
  }
  func.func @transform_1(%arg0: i32) -> (i32, i32) {
    %c0_i32 = arith.constant 0 : i32
    %c0_i32_0 = arith.constant 0 : i32
    %c0_i32_1 = arith.constant 0 : i32
    return %c0_i32, %c0_i32_0 : i32, i32
  }
  func.func @transform_2(%arg0: i32) -> (i32, i32) {
    %c0_i32 = arith.constant 0 : i32
    %c0_i32_0 = arith.constant 0 : i32
    %c0_i32_1 = arith.constant 0 : i32
    return %c0_i32, %c0_i32_0 : i32, i32
  }
  func.func @transform_3(%arg0: i32) -> (i32, i32) {
    %c0_i32 = arith.constant 0 : i32
    %c0_i32_0 = arith.constant 0 : i32
    return %arg0, %c0_i32 : i32, i32
  }
}

</mosaic_0001>

<bundles_post_ra>
// kernel: tpu_custom_call.1
= control target key start
LH: loop header
LB: loop body
LE: loop exit
PB: predicated region body
PF: predicated region fallthrough
CT: control target
= control target key end

     0   :  { %vm36_vm0 = vcmask 130048   ;;  %vm166_vm1 = vcmask 261120   ;;  %s835_s1 = inlined_call_operand.vmem [shape: f32[16,32], index: 1, kind: input, shape index: {}]   ;;  %s836_s0 = inlined_call_operand.vmem [shape: f32[128,16], index: 0, kind: input, shape index: {}]   ;;  %s837_s2 = inlined_call_operand.vmem [shape: f32[1,32], index: 2, kind: input, shape index: {}]   ;;  %s838_s3 = inlined_call_operand.vmem [shape: f32[128,32], index: 3, kind: output, shape index: {}]  }
   0x1   :  { %v31_v0 = vld [vmem:[%s835_s1 + $0x8] sm:$0xff]  ;;  %v30_v1 = vld [vmem:[%s835_s1] sm:$0xff]  ;;  %v16_v10 = vld [vmem:[%s836_s0 + $0x10] sm:$0xff] }
   0x2   :  { %99 = vmatpush.msra.mxu0 %v31_v0  ;;  %443 = vmatpush.msra.mxu1 %v31_v0  ;;  %v14_v2 = vld [vmem:[%s836_s0] sm:$0xff]  ;;  %v15_v6 = vld [vmem:[%s836_s0 + $0x8] sm:$0xff]  ;;  %v24_v11 = vld [vmem:[%s836_s0 + $0x50] sm:$0xff] }
   0x3   :  { %444 = vmatpush.msra.mxu2 %v31_v0  ;;  %445 = vmatpush.msra.mxu3 %v31_v0  ;;  %v18_v3 = vld [vmem:[%s836_s0 + $0x20] sm:$0xff]  ;;  %v23_v7 = vld [vmem:[%s836_s0 + $0x48] sm:$0xff]  ;;  %v20_v12 = vld [vmem:[%s836_s0 + $0x30] sm:$0xff] }
   0x4   :  { %v22_v4 = vld [vmem:[%s836_s0 + $0x40] sm:$0xff]  ;;  %100 = vmatpush.msra.mxu0 %v30_v1  ;;  %446 = vmatpush.msra.mxu1 %v30_v1  ;;  %v19_v8 = vld [vmem:[%s836_s0 + $0x28] sm:$0xff]  ;;  %v28_v13 = vld [vmem:[%s836_s0 + $0x70] sm:$0xff] }
   0x5   :  { %447 = vmatpush.msra.mxu2 %v30_v1  ;;  %427 = vmatmul.msk.f32.vlgmr.msra.gmra.mxu0 %vm36_vm0, %v14_v2  ;;  %v26_v5 = vld [vmem:[%s836_s0 + $0x60] sm:$0xff]  ;;  %v27_v9 = vld [vmem:[%s836_s0 + $0x68] sm:$0xff]  ;;  %v17_v14 = vld [vmem:[%s836_s0 + $0x18] sm:$0xff] }
   0x6   :  { %431 = vmatmul.msk.f32.vlgmr.msra.gmra.mxu1 %vm36_vm0, %v18_v3  ;;  %435 = vmatmul.msk.f32.vlgmr.msra.gmra.mxu2 %vm36_vm0, %v22_v4  ;;  %v25_v15 = vld [vmem:[%s836_s0 + $0x58] sm:$0xff]  ;;  %v575_v18 = vld [vmem:[%s837_s2] ss:$0 sm:$0xff] }
   0x7   :  { %448 = vmatpush.msra.mxu3 %v30_v1  ;;  %v21_v16 = vld [vmem:[%s836_s0 + $0x38] sm:$0xff] }
   0x8   :  { %439 = vmatmul.msk.f32.vlgmr.msra.gmra.mxu3 %vm36_vm0, %v26_v5  ;;  %v29_v17 = vld [vmem:[%s836_s0 + $0x78] sm:$0xff] }
   0xd   :  { %428 = vmatmul.msk.f32.gmra.mxu0 %vm36_vm0, %v15_v6 }
   0xe   :  { %436 = vmatmul.msk.f32.gmra.mxu2 %vm36_vm0, %v23_v7  ;;  %432 = vmatmul.msk.f32.gmra.mxu1 %vm36_vm0, %v19_v8 }
  0x10   :  { %440 = vmatmul.msk.f32.gmra.mxu3 %vm36_vm0, %v27_v9 }
  0x15   :  { %429 = vmatmul.msk.f32.gmra.mxu0 %vm36_vm0, %v16_v10 }
  0x16   :  { %437 = vmatmul.msk.f32.gmra.mxu2 %vm36_vm0, %v24_v11  ;;  %433 = vmatmul.msk.f32.gmra.mxu1 %vm36_vm0, %v20_v12 }
  0x18   :  { %441 = vmatmul.msk.f32.gmra.mxu3 %vm36_vm0, %v28_v13 }
  0x1d   :  { %430 = vmatmul.msk.f32.gmra.mxu0 %vm36_vm0, %v17_v14 }
  0x1e   :  { %438 = vmatmul.msk.f32.gmra.mxu2 %vm36_vm0, %v25_v15  ;;  %434 = vmatmul.msk.f32.gmra.mxu1 %vm36_vm0, %v21_v16 }
  0x20   :  { %442 = vmatmul.msk.f32.gmra.mxu3 %vm36_vm0, %v29_v17 }
  0x82   :  { %v102_v19 = vpop.f32.mrf.mxu0 }
  0x83   :  { %v578_v20 = vadd.f32 %v575_v18, %v102_v19  ;;  %v114_v21 = vpop.f32.mrf.mxu1 }
  0x84   :  { %v581_v22 = vadd.f32 %v575_v18, %v114_v21 }
  0x85   :  { %v150_v23 = vmul.f32 %v578_v20, %v578_v20 }
  0x86   :  { %v154_v24 = vmul.f32 %v581_v22, %v581_v22 }
  0x87   :  { %v167_v25 = vsel %vm166_vm1, %v150_v23, 0.0 }
  0x88   :  { %v179_v26 = vsel %vm166_vm1, %v154_v24, 0.0  ;;  %168 = vadd.xlane.f32.xlu0 %v167_v25 }
  0x89   :  { %v126_v27 = vpop.f32.mrf.mxu2  ;;  %180 = vadd.xlane.f32.xlu2 %v179_v26 }
  0x8a   :  { %v590_v28 = vadd.f32 %v575_v18, %v126_v27  ;;  %v105_v29 = vpop.f32.mrf.mxu0 }
  0x8b   :  { %v138_v30 = vpop.f32.mrf.mxu3  ;;  %v117_v31 = vpop.f32.mrf.mxu1  ;;  %v604_v37 = vadd.f32 %v575_v18, %v105_v29 }
  0x8c   :  { %v593_v32 = vadd.f32 %v575_v18, %v138_v30  ;;  %v158_v33 = vmul.f32 %v590_v28, %v590_v28  ;;  %v601_v36 = vadd.f32 %v575_v18, %v117_v31 }
  0x8d   :  { %v151_v44 = vmul.f32 %v604_v37, %v604_v37 }
  0x8e   :  { %v191_v34 = vsel %vm166_vm1, %v158_v33, 0.0  ;;  %v162_v35 = vmul.f32 %v593_v32, %v593_v32  ;;  %v155_v41 = vmul.f32 %v601_v36, %v601_v36 }
  0x8f   :  { %v170_v49 = vsel %vm166_vm1, %v151_v44, 0.0 }
  0x90   :  { %v203_v38 = vsel %vm166_vm1, %v162_v35, 0.0  ;;  %v182_v46 = vsel %vm166_vm1, %v155_v41, 0.0 }
  0x91   :  { %v129_v39 = vpop.f32.mrf.mxu2  ;;  %192 = vadd.xlane.f32.xlu2 %v191_v34  ;;  %204 = vadd.xlane.f32.xlu0 %v203_v38 }
  0x92   :  { %v108_v40 = vpop.f32.mrf.mxu0  ;;  %v619_v48 = vadd.f32 %v575_v18, %v129_v39 }
  0x93   :  { %v610_v42 = vadd.f32 %v575_v18, %v108_v40  ;;  %v141_v43 = vpop.f32.mrf.mxu3  ;;  %v120_v50 = vpop.f32.mrf.mxu1 }
  0x94   :  { %v159_v56 = vmul.f32 %v619_v48, %v619_v48  ;;  %v634_v59 = vadd.f32 %v575_v18, %v120_v50  ;;  %v668_v16 = vadd.f32 %v575_v18, %v141_v43 }
  0x95   :  { %v152_v45 = vmul.f32 %v610_v42, %v610_v42 }
  0x96   :  { %v194_v60 = vsel %vm166_vm1, %v159_v56, 0.0  ;;  %v156_v0 = vmul.f32 %v634_v59, %v634_v59  ;;  %v163_v17 = vmul.f32 %v668_v16, %v668_v16 }
  0x97   :  { %v173_v47 = vsel %vm166_vm1, %v152_v45, 0.0 }
  0x98   :  { %174 = vadd.xlane.f32.xlu1 %v173_v47  ;;  %v185_v8 = vsel %vm166_vm1, %v156_v0, 0.0  ;;  %v206_v19 = vsel %vm166_vm1, %v163_v17, 0.0 }
  0x99   :  { %v132_v51 = vpop.f32.mrf.mxu2  ;;  %183 = vadd.xlane.f32.xlu2 %v182_v46  ;;  %171 = vadd.xlane.f32.xlu0 %v170_v49 }
  0x9a   :  { %v623_v52 = vadd.f32 %v575_v18, %v132_v51  ;;  %v111_v53 = vpop.f32.mrf.mxu0 }
  0x9b   :  { %v144_v54 = vpop.f32.mrf.mxu3  ;;  %v630_v57 = vadd.f32 %v575_v18, %v111_v53  ;;  %v123_v1 = vpop.f32.mrf.mxu1 }
  0x9c   :  { %v160_v55 = vmul.f32 %v623_v52, %v623_v52  ;;  %v645_v3 = vadd.f32 %v575_v18, %v144_v54  ;;  %v651_v6 = vadd.f32 %v575_v18, %v123_v1 }
  0x9d   :  { %v153_v62 = vmul.f32 %v630_v57, %v630_v57 }
  0x9e   :  { %v197_v58 = vsel %vm166_vm1, %v160_v55, 0.0  ;;  %v164_v10 = vmul.f32 %v645_v3, %v645_v3  ;;  %v157_v11 = vmul.f32 %v651_v6, %v651_v6 }
  0x9f   :  { %v176_v5 = vsel %vm166_vm1, %v153_v62, 0.0 }
  0xa0   :  { %198 = vadd.xlane.f32.xlu1 %v197_v58  ;;  %v209_v13 = vsel %vm166_vm1, %v164_v10, 0.0  ;;  %v188_v14 = vsel %vm166_vm1, %v157_v11, 0.0 }
  0xa1   :  { %v135_v61 = vpop.f32.mrf.mxu2  ;;  %195 = vadd.xlane.f32.xlu0 %v194_v60 }
  0xa2   :  { %v640_v63 = vadd.f32 %v575_v18, %v135_v61 }
  0xa3   :  { %v147_v2 = vpop.f32.mrf.mxu3 }
  0xa4   :  { %v161_v4 = vmul.f32 %v640_v63, %v640_v63  ;;  %v656_v9 = vadd.f32 %v575_v18, %v147_v2 }
  0xa6   :  { %v200_v7 = vsel %vm166_vm1, %v161_v4, 0.0  ;;  %v165_v12 = vmul.f32 %v656_v9, %v656_v9 }
  0xa7   :  { %201 = vadd.xlane.f32.xlu2 %v200_v7 }
  0xa8   :  { %177 = vadd.xlane.f32.xlu1 %v176_v5  ;;  %v212_v15 = vsel %vm166_vm1, %v165_v12, 0.0 }
  0xa9   :  { %186 = vadd.xlane.f32.xlu0 %v185_v8 }
  0xaf   :  { %210 = vadd.xlane.f32.xlu2 %v209_v13 }
  0xb0   :  { %189 = vadd.xlane.f32.xlu1 %v188_v14 }
  0xb1   :  { %213 = vadd.xlane.f32.xlu0 %v212_v15 }
  0xb8   :  { %207 = vadd.xlane.f32.xlu1 %v206_v19 }
  0xfb   :  { %v169_v21 = vpop.xlane.xlu0 %168 }
  0xfc   :  { %v181_v23 = vpop.xlane.xlu2 %180  ;;  %v215_v24 = vmax.f32 %v169_v21, 1e-24 }
  0xfd   :  { %v219_v25 = vmax.f32 %v181_v23, 1e-24 }
  0xfe   :  { %450 = vrsqrt.f32 %v215_v24  ;;  %vm237_vm6 = vweird.f32 %v215_v24 }
  0xff   :  { %452 = vrsqrt.f32 %v219_v25  ;;  %vm277_vm2 = vweird.f32 %v219_v25 }
 0x104   :  { %v451_v26 = vpop.eup %450  ;;  %v193_v27 = vpop.xlane.xlu2 %192 }
 0x105   :  { %v205_v29 = vpop.xlane.xlu0 %204  ;;  %v453_v18 = vpop.eup %452  ;;  %v232_v30 = vmul.f32 %v451_v26, %v215_v24  ;;  %v223_v31 = vmax.f32 %v193_v27, 1e-24  ;;  %vm238_vm4 = vweird.f32 %v451_v26 }
 0x106   :  { %v673_v33 = vmax.f32 %v205_v29, 1e-24  ;;  %v272_v34 = vmul.f32 %v453_v18, %v219_v25  ;;  %vm278_vm3 = vweird.f32 %v453_v18  ;;  %vm239_vm7 = vmor %vm237_vm6, %vm238_vm4 }
 0x107   :  { %v233_v35 = vmul.f32 %v451_v26, %v232_v30  ;;  %454 = vrsqrt.f32 %v223_v31  ;;  %vm678_vm5 = vmor %vm277_vm2, %vm278_vm3  ;;  %vm317_vm11 = vweird.f32 %v223_v31 }
 0x108   :  { %v273_v38 = vmul.f32 %v453_v18, %v272_v34  ;;  %456 = vrsqrt.f32 %v673_v33  ;;  %vm357_vm9 = vweird.f32 %v673_v33 }
 0x109   :  { %v234_v39 = vmul.f32 0.5, %v233_v35 }
 0x10a   :  { %v274_v40 = vmul.f32 0.5, %v273_v38 }
 0x10b   :  { %v235_v41 = vsub.f32 1.5, %v234_v39  ;;  %v175_v43 = vpop.xlane.xlu1 %174 }
 0x10c   :  { %v275_v44 = vsub.f32 1.5, %v274_v40  ;;  %v184_v45 = vpop.xlane.xlu2 %183  ;;  %v676_v46 = vmax.f32 %v175_v43, 1e-24 }
 0x10d   :  { %v172_v47 = vpop.xlane.xlu0 %171  ;;  %v455_v49 = vpop.eup %454  ;;  %v236_v51 = vmul.f32 %v451_v26, %v235_v41  ;;  %v682_v53 = vmax.f32 %v184_v45, 1e-24 }
 0x10e   :  { %v684_v54 = vmax.f32 %v172_v47, 1e-24  ;;  %v457_v55 = vpop.eup %456  ;;  %v276_v56 = vmul.f32 %v453_v18, %v275_v44  ;;  %v312_v58 = vmul.f32 %v455_v49, %v223_v31  ;;  %458 = vrsqrt.f32 %v676_v46 }
 0x10f   :  { %v240_v60 = vsel %vm239_vm7, %v451_v26, %v236_v51  ;;  %v352_v61 = vmul.f32 %v457_v55, %v673_v33  ;;  %460 = vrsqrt.f32 %v682_v53  ;;  %vm318_vm8 = vweird.f32 %v455_v49 }
 0x110   :  { %v280_v62 = vsel %vm678_vm5, %v453_v18, %v276_v56  ;;  %v391_v0 = vmul.f32 %v240_v60, %v578_v20  ;;  %v313_v1 = vmul.f32 %v455_v49, %v312_v58  ;;  %462 = vrsqrt.f32 %v684_v54  ;;  %vm319_vm12 = vmor %vm317_vm11, %vm318_vm8 }
 0x111   :  { %v395_v2 = vmul.f32 %v280_v62, %v581_v22  ;;  %v353_v4 = vmul.f32 %v457_v55, %v352_v61  ;;  %vm358_vm10 = vweird.f32 %v457_v55  ;;  %vm287_vm14 = vweird.f32 %v682_v53 }
 0x112   :  { %407 = vst.msk [vmem:[%s838_s3] sm:$0xff] %vm166_vm1, %v391_v0  ;;  %v314_v5 = vmul.f32 0.5, %v313_v1  ;;  %vm359_vm13 = vmor %vm357_vm9, %vm358_vm10  ;;  %vm257_vm2 = vweird.f32 %v676_v46  ;;  %vm247_vm6 = vweird.f32 %v684_v54 }
 0x113   :  { %411 = vst.msk [vmem:[%s838_s3 + $0x20] sm:$0xff] %vm166_vm1, %v395_v2  ;;  %v354_v7 = vmul.f32 0.5, %v353_v4  ;;  %v199_v8 = vpop.xlane.xlu1 %198 }
 0x114   :  { %v459_v20 = vpop.eup %458  ;;  %v315_v10 = vsub.f32 1.5, %v314_v5  ;;  %v703_v22 = vmax.f32 %v199_v8, 1e-24 }
 0x115   :  { %v196_v11 = vpop.xlane.xlu0 %195  ;;  %v461_v12 = vpop.eup %460  ;;  %v355_v13 = vsub.f32 1.5, %v354_v7  ;;  %v252_v14 = vmul.f32 %v459_v20, %v676_v46  ;;  %vm258_vm15 = vweird.f32 %v459_v20 }
 0x116   :  { %v706_v15 = vmax.f32 %v196_v11, 1e-24  ;;  %v316_v17 = vmul.f32 %v455_v49, %v315_v10  ;;  %v282_v19 = vmul.f32 %v461_v12, %v682_v53  ;;  %464 = vrsqrt.f32 %v703_v22  ;;  %v463_v21 = vpop.eup %462  ;;  %vm259_vm3 = vmor %vm257_vm2, %vm258_vm15 }
 0x117   :  { %v356_v23 = vmul.f32 %v457_v55, %v355_v13  ;;  %v253_v24 = vmul.f32 %v459_v20, %v252_v14  ;;  %v242_v27 = vmul.f32 %v463_v21, %v684_v54  ;;  %vm288_vm0 = vweird.f32 %v461_v12 }
 0x118   :  { %466 = vrsqrt.f32 %v706_v15  ;;  %v320_v25 = vsel %vm319_vm12, %v455_v49, %v316_v17  ;;  %v283_v26 = vmul.f32 %v461_v12, %v282_v19  ;;  %vm248_vm4 = vweird.f32 %v463_v21  ;;  %vm289_vm5 = vmor %vm287_vm14, %vm288_vm0 }
 0x119   :  { %v399_v29 = vmul.f32 %v320_v25, %v590_v28  ;;  %v360_v18 = vsel %vm359_vm13, %v457_v55, %v356_v23  ;;  %v254_v30 = vmul.f32 0.5, %v253_v24  ;;  %v243_v35 = vmul.f32 %v463_v21, %v242_v27  ;;  %vm249_vm7 = vmor %vm247_vm6, %vm248_vm4 }
 0x11a   :  { %v403_v31 = vmul.f32 %v360_v18, %v593_v32  ;;  %v284_v34 = vmul.f32 0.5, %v283_v26  ;;  %v202_v38 = vpop.xlane.xlu2 %201  ;;  %vm337_vm10 = vweird.f32 %v703_v22  ;;  %vm327_vm12 = vweird.f32 %v706_v15 }
 0x11b   :  { %415 = vst.msk [vmem:[%s838_s3 + $0x40] sm:$0xff] %vm166_vm1, %v399_v29  ;;  %v255_v33 = vsub.f32 1.5, %v254_v30  ;;  %v721_v39 = vmax.f32 %v202_v38, 1e-24  ;;  %v178_v40 = vpop.xlane.xlu1 %177  ;;  %v244_v41 = vmul.f32 0.5, %v243_v35 }
 0x11c   :  { %v465_v28 = vpop.eup %464  ;;  %419 = vst.msk [vmem:[%s838_s3 + $0x60] sm:$0xff] %vm166_vm1, %v403_v31  ;;  %v285_v32 = vsub.f32 1.5, %v284_v34  ;;  %v727_v43 = vmax.f32 %v178_v40, 1e-24 }
 0x11d   :  { %v187_v44 = vpop.xlane.xlu0 %186  ;;  %v256_v47 = vmul.f32 %v459_v20, %v255_v33  ;;  %v332_v49 = vmul.f32 %v465_v28, %v703_v22  ;;  %468 = vrsqrt.f32 %v721_v39  ;;  %v245_v51 = vsub.f32 1.5, %v244_v41 }
 0x11e   :  { %v467_v45 = vpop.eup %466  ;;  %v286_v50 = vmul.f32 %v461_v12, %v285_v32  ;;  %470 = vrsqrt.f32 %v727_v43  ;;  %v740_v2 = vmax.f32 %v187_v44, 1e-24  ;;  %vm338_vm8 = vweird.f32 %v465_v28 }
 0x11f   :  { %v322_v55 = vmul.f32 %v467_v45, %v706_v15  ;;  %v260_v56 = vsel %vm259_vm3, %v459_v20, %v256_v47  ;;  %v333_v58 = vmul.f32 %v465_v28, %v332_v49  ;;  %v246_v61 = vmul.f32 %v463_v21, %v245_v51  ;;  %vm339_vm11 = vmor %vm337_vm10, %vm338_vm8 }
 0x120   :  { %v290_v46 = vsel %vm289_vm5, %v461_v12, %v286_v50  ;;  %v393_v60 = vmul.f32 %v260_v56, %v610_v42  ;;  %472 = vrsqrt.f32 %v740_v2  ;;  %vm328_vm9 = vweird.f32 %v467_v45 }
 0x121   :  { %v323_v62 = vmul.f32 %v467_v45, %v322_v55  ;;  %v396_v0 = vmul.f32 %v290_v46, %v601_v36  ;;  %v334_v1 = vmul.f32 0.5, %v333_v58  ;;  %v250_v53 = vsel %vm249_vm7, %v463_v21, %v246_v61  ;;  %vm329_vm13 = vmor %vm327_vm12, %vm328_vm9 }
 0x122   :  { %409 = vst.msk [vmem:[%s838_s3 + $0x10] sm:$0xff] %vm166_vm1, %v393_v60  ;;  %v211_v4 = vpop.xlane.xlu2 %210  ;;  %v392_v36 = vmul.f32 %v250_v53, %v604_v37  ;;  %vm347_vm14 = vweird.f32 %v721_v39  ;;  %vm267_vm3 = vweird.f32 %v727_v43  ;;  %vm297_vm6 = vweird.f32 %v740_v2 }
 0x123   :  { %v324_v54 = vmul.f32 0.5, %v323_v62  ;;  %v469_v5 = vpop.eup %468  ;;  %412 = vst.msk [vmem:[%s838_s3 + $0x28] sm:$0xff] %vm166_vm1, %v396_v0  ;;  %v335_v42 = vsub.f32 1.5, %v334_v1  ;;  %v190_v7 = vpop.xlane.xlu1 %189  ;;  %v753_v10 = vmax.f32 %v211_v4, 1e-24 }
 0x124   :  { %v342_v20 = vmul.f32 %v469_v5, %v721_v39  ;;  %v471_v12 = vpop.eup %470  ;;  %408 = vst.msk [vmem:[%s838_s3 + $0x8] sm:$0xff] %vm166_vm1, %v392_v36  ;;  %v760_v37 = vmax.f32 %v190_v7, 1e-24  ;;  %vm348_vm15 = vweird.f32 %v469_v5 }
 0x125   :  { %v325_v8 = vsub.f32 1.5, %v324_v54  ;;  %v214_v11 = vpop.xlane.xlu0 %213  ;;  %v336_v13 = vmul.f32 %v465_v28, %v335_v42  ;;  %v262_v19 = vmul.f32 %v471_v12, %v727_v43  ;;  %474 = vrsqrt.f32 %v753_v10  ;;  %vm349_vm2 = vmor %vm347_vm14, %vm348_vm15 }
 0x126   :  { %v343_v17 = vmul.f32 %v469_v5, %v342_v20  ;;  %v766_v23 = vmax.f32 %v214_v11, 1e-24  ;;  %v473_v27 = vpop.eup %472  ;;  %476 = vrsqrt.f32 %v760_v37  ;;  %vm268_vm0 = vweird.f32 %v471_v12 }
 0x127   :  { %v326_v14 = vmul.f32 %v467_v45, %v325_v8  ;;  %v340_v21 = vsel %vm339_vm11, %v465_v28, %v336_v13  ;;  %v263_v26 = vmul.f32 %v471_v12, %v262_v19  ;;  %vm269_vm4 = vmor %vm267_vm3, %vm268_vm0  ;;  %vm298_vm5 = vweird.f32 %v473_v27 }
 0x128   :  { %v401_v24 = vmul.f32 %v340_v21, %v623_v52  ;;  %v344_v22 = vmul.f32 0.5, %v343_v17  ;;  %v292_v52 = vmul.f32 %v473_v27, %v740_v2  ;;  %478 = vrsqrt.f32 %v766_v23  ;;  %vm299_vm7 = vmor %vm297_vm6, %vm298_vm5 }
 0x129   :  { %v330_v25 = vsel %vm329_vm13, %v467_v45, %v326_v14  ;;  %v264_v18 = vmul.f32 0.5, %v263_v26  ;;  %vm377_vm9 = vweird.f32 %v753_v10  ;;  %vm307_vm12 = vweird.f32 %v760_v37 }
 0x12a   :  { %v400_v29 = vmul.f32 %v330_v25, %v619_v48  ;;  %417 = vst.msk [vmem:[%s838_s3 + $0x50] sm:$0xff] %vm166_vm1, %v401_v24  ;;  %v345_v15 = vsub.f32 1.5, %v344_v22  ;;  %v293_v34 = vmul.f32 %v473_v27, %v292_v52  ;;  %vm387_vm13 = vweird.f32 %v766_v23 }
 0x12b   :  { %v208_v48 = vpop.xlane.xlu1 %207  ;;  %v265_v31 = vsub.f32 1.5, %v264_v18  ;;  %v475_v38 = vpop.eup %474 }
 0x12c   :  { %416 = vst.msk [vmem:[%s838_s3 + $0x48] sm:$0xff] %vm166_vm1, %v400_v29  ;;  %v346_v30 = vmul.f32 %v469_v5, %v345_v15  ;;  %v782_v35 = vmax.f32 %v208_v48, 1e-24  ;;  %v294_v28 = vmul.f32 0.5, %v293_v34  ;;  %v372_v32 = vmul.f32 %v475_v38, %v753_v10  ;;  %v477_v41 = vpop.eup %476 }
 0x12d   :  { %v266_v40 = vmul.f32 %v471_v12, %v265_v31  ;;  %v302_v39 = vmul.f32 %v477_v41, %v760_v37  ;;  %vm378_vm8 = vweird.f32 %v475_v38  ;;  %vm308_vm10 = vweird.f32 %v477_v41 }
 0x12e   :  { %v350_v33 = vsel %vm349_vm2, %v469_v5, %v346_v30  ;;  %480 = vrsqrt.f32 %v782_v35  ;;  %v295_v47 = vsub.f32 1.5, %v294_v28  ;;  %v373_v49 = vmul.f32 %v475_v38, %v372_v32  ;;  %v479_v50 = vpop.eup %478  ;;  %vm379_vm11 = vmor %vm377_vm9, %vm378_vm8 }
 0x12f   :  { %v402_v44 = vmul.f32 %v350_v33, %v640_v63  ;;  %v270_v45 = vsel %vm269_vm4, %v471_v12, %v266_v40  ;;  %v303_v55 = vmul.f32 %v477_v41, %v302_v39  ;;  %v382_v56 = vmul.f32 %v479_v50, %v766_v23  ;;  %vm309_vm15 = vmor %vm307_vm12, %vm308_vm10 }
 0x130   :  { %v394_v43 = vmul.f32 %v270_v45, %v630_v57  ;;  %v296_v63 = vmul.f32 %v473_v27, %v295_v47  ;;  %v374_v51 = vmul.f32 0.5, %v373_v49  ;;  %vm388_vm14 = vweird.f32 %v479_v50 }
 0x131   :  { %418 = vst.msk [vmem:[%s838_s3 + $0x58] sm:$0xff] %vm166_vm1, %v402_v44  ;;  %v304_v60 = vmul.f32 0.5, %v303_v55  ;;  %v383_v61 = vmul.f32 %v479_v50, %v382_v56  ;;  %vm389_vm0 = vmor %vm387_vm13, %vm388_vm14  ;;  %vm367_vm3 = vweird.f32 %v782_v35 }
 0x132   :  { %410 = vst.msk [vmem:[%s838_s3 + $0x18] sm:$0xff] %vm166_vm1, %v394_v43  ;;  %v300_v58 = vsel %vm299_vm7, %v473_v27, %v296_v63  ;;  %v375_v46 = vsub.f32 1.5, %v374_v51 }
 0x133   :  { %v397_v62 = vmul.f32 %v300_v58, %v634_v59  ;;  %v305_v1 = vsub.f32 1.5, %v304_v60  ;;  %v384_v2 = vmul.f32 0.5, %v383_v61 }
 0x134   :  { %v481_v57 = vpop.eup %480  ;;  %v376_v0 = vmul.f32 %v475_v38, %v375_v46 }
 0x135   :  { %v362_v53 = vmul.f32 %v481_v57, %v782_v35  ;;  %413 = vst.msk [vmem:[%s838_s3 + $0x30] sm:$0xff] %vm166_vm1, %v397_v62  ;;  %v306_v54 = vmul.f32 %v477_v41, %v305_v1  ;;  %v385_v4 = vsub.f32 1.5, %v384_v2  ;;  %vm368_vm2 = vweird.f32 %v481_v57 }
 0x136   :  { %v380_v59 = vsel %vm379_vm11, %v475_v38, %v376_v0  ;;  %vm369_vm4 = vmor %vm367_vm3, %vm368_vm2 }
 0x137   :  { %v363_v5 = vmul.f32 %v481_v57, %v362_v53  ;;  %v405_v36 = vmul.f32 %v380_v59, %v645_v3  ;;  %v310_v42 = vsel %vm309_vm15, %v477_v41, %v306_v54  ;;  %v386_v7 = vmul.f32 %v479_v50, %v385_v4 }
 0x138   :  { %v398_v20 = vmul.f32 %v310_v42, %v651_v6 }
 0x139   :  { %v364_v8 = vmul.f32 0.5, %v363_v5  ;;  %421 = vst.msk [vmem:[%s838_s3 + $0x70] sm:$0xff] %vm166_vm1, %v405_v36  ;;  %v390_v10 = vsel %vm389_vm0, %v479_v50, %v386_v7 }
 0x13a   :  { %414 = vst.msk [vmem:[%s838_s3 + $0x38] sm:$0xff] %vm166_vm1, %v398_v20  ;;  %v406_v3 = vmul.f32 %v390_v10, %v656_v9 }
 0x13b   :  { %v365_v11 = vsub.f32 1.5, %v364_v8 }
 0x13c   :  { %422 = vst.msk [vmem:[%s838_s3 + $0x78] sm:$0xff] %vm166_vm1, %v406_v3 }
 0x13d   :  { %v366_v12 = vmul.f32 %v481_v57, %v365_v11 }
 0x13f   :  { %v370_v6 = vsel %vm369_vm4, %v481_v57, %v366_v12 }
 0x140   :  { %v404_v13 = vmul.f32 %v370_v6, %v668_v16 }
 0x142   :  { %420 = vst.msk [vmem:[%s838_s3 + $0x68] sm:$0xff] %vm166_vm1, %v404_v13 }

</bundles_post_ra>
